<compile_context>
chip_gen: v6e
topology: v6e:2x2x1
jax: 0.10.0
libtpu: 0.0.40
codegen_flags: <defaults>
</compile_context>

<pallas_src>
import functools

import jax
import jax.numpy as jnp
from jax.experimental import pallas as pl
from jax.experimental.pallas import tpu as pltpu

N_COPIES = 6


def _round_up(x, m):
    return (x + m - 1) // m * m


def _cat_mm_kernel(x1_ref, x2_ref, out_ref, acc_ref, *, k_steps):
    t = pl.program_id(2)

    @pl.when(t == 0)
    def _init():
        acc_ref[...] = jnp.zeros_like(acc_ref)

    @pl.when(t < k_steps)
    def _accumulate():
        acc_ref[...] += jnp.dot(
            x1_ref[...], x2_ref[...], preferred_element_type=jnp.float32
        )

    # Steps k_steps-1 .. k_steps+4: the output BlockSpec points at replica
    # c = t - (k_steps - 1).  Cast from the f32 accumulator and store the full
    # lane-dense (tm, tn) block; the writeback DMA for each replica fires when
    # the output block index changes on the next step.
    @pl.when(t >= k_steps - 1)
    def _store_replica():
        out_ref[...] = acc_ref[...].astype(out_ref.dtype)


def cat_mm(x1, x2, *, tm=256, tn=256, tk=512):
    """out[:, c*N:(c+1)*N] = x1 @ x2 for c in range(6) (torch.cat semantics)."""
    M, K = x1.shape
    K2, N = x2.shape
    assert K == K2, (x1.shape, x2.shape)
    out_dtype = x1.dtype
    itemsize = jnp.dtype(out_dtype).itemsize

    # Clamp tile sizes to the (aligned) problem size, keeping (sublane, lane)
    # minima of (8, 128) so every block is tile-aligned and stores stay
    # unmasked (lane-dense output is the biggest lever for this kernel).
    tm = min(tm, _round_up(M, 8))
    tk = min(tk, _round_up(K, 128))
    tn = min(tn, _round_up(N, 128))
    Mp, Kp, Np = _round_up(M, tm), _round_up(K, tk), _round_up(N, tn)

    if (Mp, Kp) != (M, K):
        x1 = jnp.pad(x1, ((0, Mp - M), (0, Kp - K)))
    if (Kp, Np) != (K, N):
        x2 = jnp.pad(x2, ((0, Kp - K), (0, Np - N)))

    m_tiles, n_tiles, k_steps = Mp // tm, Np // tn, Kp // tk
    k_last = k_steps - 1
    grid = (m_tiles, n_tiles, k_steps + N_COPIES - 1)

    # During the replica steps (t > k_last) the input index maps clamp to the
    # last K block, so the pipeline does not re-stage inputs.
    x1_spec = pl.BlockSpec((tm, tk), lambda i, j, t: (i, jnp.minimum(t, k_last)))
    x2_spec = pl.BlockSpec((tk, tn), lambda i, j, t: (jnp.minimum(t, k_last), j))
    out_spec = pl.BlockSpec(
        (tm, tn),
        lambda i, j, t: (i, jnp.maximum(t - k_last, 0) * n_tiles + j),
    )

    # VMEM budget: double-buffered input/output blocks + the f32 accumulator.
    vmem_bytes = (
        2 * (tm * tk + tk * tn + tm * tn) * itemsize + tm * tn * 4 + (1 << 20)
    )

    out = pl.pallas_call(
        functools.partial(_cat_mm_kernel, k_steps=k_steps),
        out_shape=jax.ShapeDtypeStruct((Mp, N_COPIES * Np), out_dtype),
        grid=grid,
        in_specs=[x1_spec, x2_spec],
        out_specs=out_spec,
        scratch_shapes=[pltpu.VMEM((tm, tn), jnp.float32)],
        compiler_params=pltpu.CompilerParams(
            dimension_semantics=("parallel", "parallel", "arbitrary"),
            vmem_limit_bytes=max(vmem_bytes, 32 * 1024 * 1024),
        ),
        cost_estimate=pl.CostEstimate(
            flops=2 * Mp * Kp * Np,  # ONE matmul, not six.
            bytes_accessed=itemsize * (Mp * Kp + Kp * Np + Mp * N_COPIES * Np),
            transcendentals=0,
        ),
    )(x1, x2)

    if (Mp, Np) != (M, N):
        # Undo padding while preserving the torch.cat column layout.
        out = out.reshape(Mp, N_COPIES, Np)[:M, :, :N].reshape(M, N_COPIES * N)
    return out


if __name__ == "__main__":
    key = jax.random.PRNGKey(0)
    k1, k2, k3, k4 = jax.random.split(key, 4)

    # Small tile-aligned case; explicit tiles so the grid exercises M/N tiling,
    # K accumulation and the replica-writeback steps: grid = (2, 2, 2 + 5).
    M, K, N = 256, 512, 256
    x1 = jax.random.normal(k1, (M, K), dtype=jnp.float32)
    x2 = jax.random.normal(k2, (K, N), dtype=jnp.float32)
    out = jax.block_until_ready(cat_mm(x1, x2, tm=128, tn=128, tk=256))
    v = x1 @ x2
    ref = jnp.concatenate([v] * N_COPIES, axis=1)
    assert out.shape == (M, N_COPIES * N), out.shape
    assert jnp.allclose(out, ref, atol=1e-3, rtol=1e-3), float(
        jnp.max(jnp.abs(out - ref))
    )

    # Unaligned tiny case (in the spirit of the original module's (2, 4) input):
    # the wrapper zero-pads to aligned tiles and slices the result back.
    M2, K2, N2 = 2, 4, 12
    y1 = jax.random.normal(k3, (M2, K2), dtype=jnp.float32)
    y2 = jax.random.normal(k4, (K2, N2), dtype=jnp.float32)
    out2 = jax.block_until_ready(cat_mm(y1, y2))
    ref2 = jnp.concatenate([y1 @ y2] * N_COPIES, axis=1)
    assert out2.shape == (M2, N_COPIES * N2), out2.shape
    assert jnp.allclose(out2, ref2, atol=1e-3, rtol=1e-3), float(
        jnp.max(jnp.abs(out2 - ref2))
    )

    print("KERNEL_OK")
</pallas_src>

<mosaic_0001>
module attributes {stable_mosaic.version = 11 : i64} {
  func.func @_cat_mm_kernel(%arg0: i32, %arg1: i32, %arg2: i32, %arg3: memref<128x256xf32, #tpu.memory_space<vmem>>, %arg4: memref<256x128xf32, #tpu.memory_space<vmem>>, %arg5: memref<128x128xf32, #tpu.memory_space<vmem>>, %arg6: memref<128x128xf32, #tpu.memory_space<vmem>>) attributes {dimension_semantics = [#tpu.dimension_semantics<parallel>, #tpu.dimension_semantics<parallel>, #tpu.dimension_semantics<arbitrary>], iteration_bounds = array<i64: 2, 2, 7>, scalar_prefetch = 0 : i64, scratch_operands = 1 : i64, tpu.core_type = #tpu.core_type<tc>, window_params = [{transform_indices = @transform_0, window_bounds = array<i64: 128, 256>}, {transform_indices = @transform_1, window_bounds = array<i64: 256, 128>}, {transform_indices = @transform_2, window_bounds = array<i64: 128, 128>}]} {
    %c0_i32 = arith.constant 0 : i32
    %0 = arith.cmpi eq, %arg2, %c0_i32 : i32
    %1 = arith.extui %0 : i1 to i32
    %c0_i32_0 = arith.constant 0 : i32
    %2 = arith.cmpi ne, %1, %c0_i32_0 : i32
    scf.if %2 {
      %cst = arith.constant 0.000000e+00 : f32
      %9 = vector.broadcast %cst : f32 to vector<128x128xf32>
      %c0 = arith.constant 0 : index
      %c0_3 = arith.constant 0 : index
      %10 = vector.load %arg6[%c0, %c0_3] : memref<128x128xf32, #tpu.memory_space<vmem>>, vector<128x128xf32>
      tpu.vector_store %arg6[%c0, %c0_3], %9 {strides = array<i32>} : memref<128x128xf32, #tpu.memory_space<vmem>>, vector<128x128xf32>,
    } else {
    }
    %c2_i32 = arith.constant 2 : i32
    %3 = arith.cmpi slt, %arg2, %c2_i32 : i32
    %4 = arith.extui %3 : i1 to i32
    %c0_i32_1 = arith.constant 0 : i32
    %5 = arith.cmpi ne, %4, %c0_i32_1 : i32
    scf.if %5 {
      %c0 = arith.constant 0 : index
      %c0_3 = arith.constant 0 : index
      %9 = vector.load %arg6[%c0, %c0_3] : memref<128x128xf32, #tpu.memory_space<vmem>>, vector<128x128xf32>
      %c0_4 = arith.constant 0 : index
      %c0_5 = arith.constant 0 : index
      %10 = vector.load %arg3[%c0_4, %c0_5] : memref<128x256xf32, #tpu.memory_space<vmem>>, vector<128x256xf32>
      %c0_6 = arith.constant 0 : index
      %c0_7 = arith.constant 0 : index
      %11 = vector.load %arg4[%c0_6, %c0_7] : memref<256x128xf32, #tpu.memory_space<vmem>>, vector<256x128xf32>
      %cst = arith.constant dense<0.000000e+00> : vector<128x128xf32>
      %12 = tpu.matmul %10, %11, %cst {dimension_numbers = #tpu.dot_dimension_numbers<[1], [0], [0], [1], [0, 0, 1, 1], [], []>} : vector<128x256xf32>, vector<256x128xf32>, vector<128x128xf32> -> vector<128x128xf32>
      %13 = arith.addf %9, %12 : vector<128x128xf32>
      %c0_8 = arith.constant 0 : index
      %c0_9 = arith.constant 0 : index
      %14 = vector.load %arg6[%c0_8, %c0_9] : memref<128x128xf32, #tpu.memory_space<vmem>>, vector<128x128xf32>
      tpu.vector_store %arg6[%c0_8, %c0_9], %13 {strides = array<i32>} : memref<128x128xf32, #tpu.memory_space<vmem>>, vector<128x128xf32>,
    } else {
    }
    %c1_i32 = arith.constant 1 : i32
    %6 = arith.cmpi sge, %arg2, %c1_i32 : i32
    %7 = arith.extui %6 : i1 to i32
    %c0_i32_2 = arith.constant 0 : i32
    %8 = arith.cmpi ne, %7, %c0_i32_2 : i32
    scf.if %8 {
      %c0 = arith.constant 0 : index
      %c0_3 = arith.constant 0 : index
      %9 = vector.load %arg6[%c0, %c0_3] : memref<128x128xf32, #tpu.memory_space<vmem>>, vector<128x128xf32>
      %c0_4 = arith.constant 0 : index
      %c0_5 = arith.constant 0 : index
      %10 = vector.load %arg5[%c0_4, %c0_5] : memref<128x128xf32, #tpu.memory_space<vmem>>, vector<128x128xf32>
      tpu.vector_store %arg5[%c0_4, %c0_5], %9 {strides = array<i32>} : memref<128x128xf32, #tpu.memory_space<vmem>>, vector<128x128xf32>,
    } else {
    }
    return
  }
  func.func @transform_0(%arg0: i32, %arg1: i32, %arg2: i32) -> (i32, i32) {
    %c1_i32 = arith.constant 1 : i32
    %0 = arith.minsi %arg2, %c1_i32 : i32
    %c0_i32 = arith.constant 0 : i32
    return %arg0, %0 : i32, i32
  }
  func.func @transform_1(%arg0: i32, %arg1: i32, %arg2: i32) -> (i32, i32) {
    %c1_i32 = arith.constant 1 : i32
    %0 = arith.minsi %arg2, %c1_i32 : i32
    %c0_i32 = arith.constant 0 : i32
    return %0, %arg1 : i32, i32
  }
  func.func @transform_2(%arg0: i32, %arg1: i32, %arg2: i32) -> (i32, i32) {
    %c1_i32 = arith.constant 1 : i32
    %0 = arith.subi %arg2, %c1_i32 : i32
    %c0_i32 = arith.constant 0 : i32
    %1 = arith.maxsi %0, %c0_i32 : i32
    %c2_i32 = arith.constant 2 : i32
    %2 = arith.muli %1, %c2_i32 : i32
    %3 = arith.addi %2, %arg1 : i32
    %c0_i32_0 = arith.constant 0 : i32
    return %arg0, %3 : i32, i32
  }
}

</mosaic_0001>

<bundles_post_ra>
// kernel: tpu_custom_call.1
= control target key start
LH: loop header
LB: loop body
LE: loop exit
PB: predicated region body
PF: predicated region fallthrough
CT: control target
= control target key end

     0   :  { %s1722_s0 = inlined_call_operand.hbm [shape: f32[256,512], index: 0, kind: input, shape index: {}]   ;;  %s1723_s1 = inlined_call_operand.hbm [shape: f32[512,256], index: 1, kind: input, shape index: {}]   ;;  %s1724_s2 = inlined_call_operand.hbm [shape: f32[256,1536], index: 2, kind: output, shape index: {}]  }
   0x1   :  { %1748 = sst [smem:[#allocation29_spill]] %s1722_s0 }
   0x2   :  { %1749 = sst [smem:[#allocation30_spill]] %s1724_s2 }
   0x3   :  { %7 = vsyncpa [#allocation4], 0 }
   0x4   :  { %9 = vsyncpa [#allocation4 + $0x1], 0 }
   0x5   :  { %10 = vsyncpa [#allocation7], 0 }
   0x6   :  { %12 = vsyncpa [#allocation7 + $0x1], 0 }
   0x7   :  { %13 = vsyncpa [#allocation5], 0 }
   0x8   :  { %15 = vsyncpa [#allocation5 + $0x1], 0  ;;  %s1279_s9 = smov 0   ;;  %s1281_s10 = smov 0  }
   0x9   :  { %s1283_s11 = smov 0   ;;  %s1285_s12 = smov 0  }
   0xa   :  { %s1287_s13 = smov 0   ;;  %s1289_s14 = smov 0  }
   0xb   :  { %s1291_s15 = smov 0   ;;  %s1293_s16 = smov 0  }
   0xc   :  { %s1295_s17 = smov 0   ;;  %s1297_s18 = smov 0  }
   0xd   :  { %s1299_s19 = smov 0   ;;  %s1301_s20 = smov 0  }
   0xe   :  { %s1303_s21 = smov 0   ;;  %s1305_s22 = smov 0  }
   0xf   :  { %s1307_s23 = smov 0   ;;  %s1309_s24 = smov 0  }
  0x10 LB: > { %1750 = sst [smem:[#allocation12_spill]] %s1190_s9  ;;  %s727_s25 = sadd.s32 4294967295, %s1250_s24   ;;  %s1250_s24 = sphi %s1309_s24, %s21_s24   ;;  %s1246_s23 = sphi %s1307_s23, %s1829_s23   ;;  %s1242_s22 = sphi %s1305_s22, %s1828_s22   ;;  %s1238_s21 = sphi %s1303_s21, %s1815_s21   ;;  %s1234_s20 = sphi %s1301_s20, %s1827_s20   ;;  %s1230_s19 = sphi %s1299_s19, %s1826_s19   ;;  %s1226_s18 = sphi %s1297_s18, %s1813_s18   ;;  %s1222_s17 = sphi %s1295_s17, %s1825_s17   ;;  %s1218_s16 = sphi %s1293_s16, %s1824_s16   ;;  %s1214_s15 = sphi %s1291_s15, %s1823_s15   ;;  %s1210_s14 = sphi %s1289_s14, %s1822_s14   ;;  %s1206_s13 = sphi %s1287_s13, %s1809_s13   ;;  %s1202_s12 = sphi %s1285_s12, %s1821_s12   ;;  %s1198_s11 = sphi %s1283_s11, %s1820_s11   ;;  %s1194_s10 = sphi %s1281_s10, %s1819_s10   ;;  %s1190_s9 = sphi %s1279_s9, %s1807_s9  }
  0x11   : > { %1751 = sst [smem:[#allocation13_spill]] %s1194_s10  ;;  %s728_s26 = sadd.s32 4294967294, %s1250_s24  }
  0x12   : > { %1752 = sst [smem:[#allocation14_spill]] %s1206_s13  ;;  %s33_s27 = sadd.s32 1, %s1238_s21 }
  0x13   : > { %1753 = sst [smem:[#allocation15_spill]] %s1210_s14  ;;  %p1361_p0 = scmp.ge.s32.totalorder %s33_s27, 7 }
  0x14   : > { %1754 = sst [smem:[#allocation16_spill]] %s1218_s16  ;;  %p44_p1 = scmp.lt.s32.totalorder %s1238_s21, 1 }
  0x15   : > { %1755 = sst [smem:[#allocation17_spill]] %s1226_s18  ;;  %p60_p2 = scmp.ne.s32.totalorder %s1222_s17, %s1218_s16 }
  0x16   : > { %1756 = sst [smem:[#allocation18_spill]] %s1230_s19  ;;  %s1831_s27 = smov (%p1361_p0, %s33_s27), 0 }
  0x17   : > { %1757 = sst [smem:[#allocation19_spill]] %s1234_s20  ;;  %p46_p3 = scmp.lt.s32.totalorder %s1831_s27, 1 }
  0x18   : > { %1758 = sst [smem:[#allocation20_spill]] %s1238_s21  ;;  %p1736_p4 = scmp.eq.s32.totalorder %s1250_s24, 0 }
  0x19   : > { %1759 = sst [smem:[#allocation21_spill]] %s1246_s23  ;;  %p66_p5 = scmp.ne.s32.totalorder %s1218_s16, %s1214_s15 }
  0x1a   : > { %1761 = sst [smem:[#allocation22_spill]] %s1831_s27  ;;  %p1379_p6 = scmp.eq.s32.totalorder %s727_s25, 0 }
  0x1b   : > { %s1374_s3 = scalar_select %p44_p1, %s1238_s21, 1 }
  0x1c   : > { %s47_s5 = scalar_select %p46_p3, %s1831_s27, 1 }
  0x1d   : > { %p1386_p7 = por %p1736_p4, %p60_p2  ;;  %p1392_p8 = por %p1379_p6, %p66_p5 }
  0x1e   : > { %s1397_s8 = ssub.s32 %s1374_s3, %s47_s5  ;;  %s1725_s15 = sadd.s32 4294967295, %s1238_s21 }
  0x1f   : > { %s1764_s7 = scalar_select %p1392_p8, 1, 0 }
  0x20   : > { %p1402_p9 = scmp.gt.s32.totalorder %s1725_s15, 0  ;;  %p133_p10 = scmp.ne.s32.totalorder %s1198_s11, %s1194_s10 }
  0x21   : > { %1765 = sst [smem:[#allocation23_spill]] %s1764_s7  ;;  %p134_p11 = scmp.eq.s32.totalorder %s727_s25, 27 }
  0x22   : > { %p139_p12 = scmp.ne.s32.totalorder %s1194_s10, %s1190_s9  ;;  %p140_p13 = scmp.eq.s32.totalorder %s728_s26, 27 }
  0x23   : > { %p1410_p1 = por %p134_p11, %p133_p10  ;;  %p1737_p2 = scmp.lt.s32.totalorder %s1250_s24, 28 }
  0x24   : > { %p1415_p3 = por %p140_p13, %p139_p12  ;;  %s160_s15 = sand.u32 1, %s1222_s17  }
  0x25   : > { %s1767_s28 = scalar_select %p1410_p1, 1, 0 }
  0x26   : > { %s1769_s5 = scalar_select %p1415_p3, 1, 0 }
  0x27   : > { %1768 = sst [smem:[#allocation24_spill]] %s1767_s28  ;;  %s735_s2 = sshll.u32 %s160_s15, 8 }
  0x28   : > { %1770 = sst [smem:[#allocation25_spill]] %s1769_s5  ;;  %s737_s19 = sshll.u32 %s1374_s3, 1 }
  0x29   : > { %s759_s20 = sshll.u32 %s1246_s23, 6  ;;  %s164_s18 = scalar_lea.vmem [#allocation3], %s735_s2 }
  0x2a   : > { %s176_s7 = sshll.u32 %s164_s18, 4  ;;  %s173_s16 = sadd.s32 %s759_s20, %s737_s19  ;;  %s177_s7 = int_to_ptr.vmem [resolvable:$true] %s176_s7 }
  0x2b   : > { %s739_s25 = sshll.u32 %s173_s16, 7  ;;  %p1426_p5 = pnand %p1737_p2, %p1386_p7 }
  0x2c   : > { %s1772_s0 = sld [smem:[#allocation29_spill]]  ;;  %p744_p10 = scmp.ge.s32.totalorder %s1250_s24, 1 }
  0x2d   : > { %s161_s10 = scalar_lea.sflag [#allocation4], %s160_s15  ;;  %p1032_p11 = pneg %p1426_p5 }
  0x2e   : > { %s1043_s2 = scalar_lea.vmem %s177_s7, 4096  ;;  %s1252_s16 = smov [#allocation3]  }
  0x2f   : > { %p1044_p12 = scmp.ne.s32.totalorder %s177_s7, %s1043_s2  ;;  %s1048_s18 = sshll.u32 %s1252_s16, 4  ;;  %s1049_s18 = int_to_ptr.vmem [resolvable:$false] %s1048_s18 }
  0x30   : > { %s1050_s19 = scalar_lea.vmem %s1049_s18, 8192  ;;  %p1051_p7 = scmp.lt.s32.totalorder %s177_s7, %s1049_s18 }
  0x31   : > { %p1046_p13 = pnand %p1044_p12, %p1032_p11  ;;  %p1052_p2 = scmp.lt.s32.totalorder %s1050_s19, %s1043_s2 }
  0x32   : > { %s175_s5 = scalar_lea.hbm %s1772_s0, %s739_s25 }
  0x33   : > { %p1047_p4 = pneg %p1046_p13  ;;  %p1053_p3 = por %p1052_p2, %p1051_p7 }
  0x35   : > { %p1054_p1 = pnand %p1053_p3, %p1047_p4 }
  0x37   : > { %1057 = shalt.err (!%p1054_p1)
}
  0x38   : > { %s1253_s9 = smov 512   ;;  %s1739_s20 = smov 256  }
  0x39   : > { %s1255_s28 = smov 16   ;;  %p209_p4 = scmp.lt.s32.totalorder %s1250_s24, 29 }
  0x3a   : > { %883 = dma.hbm_to_vmem [thread:$0]  (!%p1426_p5), %s175_s5, 4096, %s177_s7, %s161_s10, %s1253_s9, %s1739_s20, %s1255_s28  }
  0x3b   : > { %p1442_p1 = pnand %p744_p10, %p209_p4  ;;  %s36_s15 = sadd.s32 1, %s1242_s22 }
  0x3c   : > { %s85_s25 = sadd.s32 1, %s1210_s14  ;;  %s1833_s15 = smov (!%p1361_p0, %s36_s15), %s1242_s22 }
  0x3d   : > { %p92_p2 = scmp.ne.s32.totalorder %s1210_s14, %s1206_s13  ;;  %p98_p3 = scmp.ne.s32.totalorder %s1206_s13, %s1202_s12 }
  0x3e   : > { %p38_p11 = scmp.ge.s32.totalorder %s1833_s15, 2  ;;  %s731_s10 = sadd.s32 4294967295, %s1831_s27 }
  0x3f   : > { %p1774_p5 = scmp.eq.s32.totalorder %s1250_s24, 0  ;;  %p1464_p10 = por %p98_p3, %p1379_p6 }
  0x40   : > { %s1835_s15 = smov (%p38_p11, %s1833_s15), 0  ;;  %s1778_s29 = sadd.s32 1, %s1246_s23 }
  0x41   : > { %p1458_p12 = por %p92_p2, %p1774_p5  ;;  %s1837_s29 = smov (!%p38_p11, %s1778_s29), %s1246_s23 }
  0x42   : > { %s1776_s5 = scalar_select %p1464_p10, 1, 0 }
  0x43   : > { %s81_s12 = ssub.s32 %s1242_s22, %s1835_s15  ;;  %p1475_p0 = scmp.gt.s32.totalorder %s731_s10, 0 }
  0x44   : > { %1777 = sst [smem:[#allocation26_spill]] %s1776_s5  ;;  %p42_p6 = scmp.ge.s32.totalorder %s1837_s29, 2 }
  0x45   : > { %s82_s4 = sor.u32 %s81_s12, %s1397_s8  ;;  %s123_s2 = sadd.s32 1, %s1198_s11 }
  0x46   : > { %p83_p13 = scmp.eq.s32.totalorder %s82_s4, 0  ;;  %s1839_s29 = smov (%p42_p6, %s1837_s29), 0 }
  0x47   : > { %1780 = sst [smem:[#allocation27_spill]] %s1839_s29  ;;  %s48_s18 = ssub.s32 %s1246_s23, %s1839_s29 }
  0x48   : > { %s1484_s16 = scalar_select %p83_p13, %s1210_s14, %s85_s25  }
  0x49   : > { %s186_s19 = sand.u32 1, %s1210_s14   ;;  %s50_s9 = sor.u32 %s1397_s8, %s48_s18 }
  0x4a   : > { %1781 = sst [smem:[#allocation28_spill]] %s1484_s16  ;;  %p51_p7 = scmp.eq.s32.totalorder %s50_s9, 0 }
  0x4b   : > { %s740_s28 = sshll.u32 %s186_s19, 8  ;;  %s1782_s20 = sadd.s32 4294967295, %s1238_s21 }
  0x4c   : > { %s1841_s20 = smov (!%p1402_p9, %s1782_s20), 0  ;;  %s1783_s0 = sadd.s32 1, %s1222_s17 }
  0x4d   : > { %s1497_s12 = scalar_select %p51_p7, %s1222_s17, %s1783_s0  }
  0x4e   : > { %s730_s4 = sshll.u32 %s1841_s20, 1  ;;  %s760_s5 = sshll.u32 %s1374_s3, 6 }
  0x4f   : > { %s112_s27 = sadd.s32 %s1242_s22, %s730_s4  ;;  %s1843_s10 = smov (!%p1475_p0, %s731_s10), 0 }
  0x50   : > { %s198_s25 = sadd.s32 %s1242_s22, %s760_s5  ;;  %s190_s29 = scalar_lea.vmem [#allocation6], %s740_s28 }
  0x51   : > { %s201_s23 = sshll.u32 %s190_s29, 4  ;;  %s732_s8 = sshll.u32 %s1843_s10, 1  ;;  %s202_s23 = int_to_ptr.vmem [resolvable:$true] %s201_s23 }
  0x52   : > { %s743_s9 = sshll.u32 %s198_s25, 7  ;;  %s117_s16 = sadd.s32 %s732_s8, %s1835_s15 }
  0x53   : > { %s200_s14 = scalar_lea.hbm %s1723_s1, %s743_s9  ;;  %s119_s13 = ssub.s32 %s112_s27, %s117_s16 }
  0x54   : > { %s120_s0 = sor.u32 %s119_s13, %s48_s18  ;;  %p1784_p9 = scmp.lt.s32.totalorder %s1250_s24, 28 }
  0x55   : > { %p121_p2 = scmp.eq.s32.totalorder %s120_s0, 0  ;;  %s187_s10 = scalar_lea.sflag [#allocation7], %s186_s19 }
  0x56   : > { %p1512_p4 = pnand %p1784_p9, %p1458_p12  ;;  %s1071_s5 = scalar_lea.vmem %s202_s23, 4096 }
  0x57   : > { %s1517_s3 = scalar_select %p121_p2, %s1198_s11, %s123_s2  }
  0x58   : > { %p1060_p3 = pneg %p1512_p4  ;;  %p1072_p11 = scmp.ne.s32.totalorder %s202_s23, %s1071_s5 }
  0x59   : > { %s1256_s21 = smov [#allocation6]  }
  0x5a   : > { %p1074_p5 = pnand %p1072_p11, %p1060_p3  ;;  %s1076_s27 = sshll.u32 %s1256_s21, 4  ;;  %s1077_s27 = int_to_ptr.vmem [resolvable:$false] %s1076_s27 }
  0x5b   : > { %s1078_s13 = scalar_lea.vmem %s1077_s27, 8192  ;;  %p1079_p6 = scmp.lt.s32.totalorder %s202_s23, %s1077_s27 }
  0x5c   : > { %p1075_p0 = pneg %p1074_p5  ;;  %p1080_p12 = scmp.lt.s32.totalorder %s1078_s13, %s1071_s5 }
  0x5e   : > { %p1081_p13 = por %p1080_p12, %p1079_p6 }
  0x60   : > { %p1082_p7 = pnand %p1081_p13, %p1075_p0 }
  0x62   : > { %1085 = shalt.err (!%p1082_p7)
}
  0x63   : > { %s1257_s7 = smov 128   ;;  %s1258_s29 = smov 8  }
  0x64   : > { %s1786_s26 = smov 256   ;;  %213 = sbr.rel (%p1442_p1) target bundleno = 473 (0x1d9), region = 28 }
  0x65   : > { %886 = dma.hbm_to_vmem [thread:$0]  (!%p1512_p4), %s200_s14, 4096, %s202_s23, %s187_s10, %s1786_s26, %s1257_s7, %s1258_s29  }
  0x66   : > { %s1787_s2 = sld [smem:[#allocation16_spill]] (!%p1442_p1) }
  0x6c   : > { %s215_s18 = sand.u32 1, %s1787_s2  }
  0x6d   : > { %s745_s19 = sshll.u32 %s215_s18, 8  ;;  %s216_s28 = scalar_lea.sflag [#allocation4], %s215_s18 }
  0x6e   : > { %s1527_s4 = scalar_lea.vmem [#allocation3], %s745_s19 }
  0x6f   : > { %1177 = dma.done.wait (%p1392_p8), %s216_s28, 4096  }
  0x70   : > { %1179 = vsyncadd (%p1392_p8), %s216_s28, 4294963200  ;;  %s1789_s25 = sld [smem:[#allocation14_spill]] }
  0x76   : > { %s224_s9 = sand.u32 1, %s1789_s25  }
  0x77   : > { %s746_s30 = sshll.u32 %s224_s9, 8  ;;  %s225_s14 = scalar_lea.sflag [#allocation7], %s224_s9 }
  0x78   : > { %s1534_s23 = scalar_lea.vmem [#allocation6], %s746_s30 }
  0x79   : > { %1181 = dma.done.wait (%p1464_p10), %s225_s14, 4096  }
  0x7a   : > { %1183 = vsyncadd (%p1464_p10), %s225_s14, 4294963200  ;;  %s1791_s6 = sld [smem:[#allocation13_spill]] }
  0x7b   : > { %s1792_s5 = sld [smem:[#allocation17_spill]] }
  0x80   : > { %s251_s0 = sand.u32 1, %s1791_s6  }
  0x81   : > { %s747_s20 = sshll.u32 %s251_s0, 7  ;;  %p748_p8 = scmp.ne.s32.totalorder %s1792_s5, 0 }
  0x82   : > { %s1543_s10 = scalar_lea.vmem [#allocation8], %s747_s20 }
  0x83   : > { %270 = sbr.rel (%p748_p8) target bundleno = 145 (0x91), region = 40 }
  0x88   : > { %v1259_v0 = vmov 0.0  }
  0x89   : > { %271 = vst [vmem:[#allocation2 + $0x30] sm:$0xff] %v1259_v0  ;;  %272 = vst [vmem:[#allocation2] sm:$0xff] %v1259_v0 }
  0x8a   : > { %273 = vst [vmem:[#allocation2 + $0x58] sm:$0xff] %v1259_v0  ;;  %274 = vst [vmem:[#allocation2 + $0x18] sm:$0xff] %v1259_v0 }
  0x8b   : > { %275 = vst [vmem:[#allocation2 + $0x50] sm:$0xff] %v1259_v0  ;;  %276 = vst [vmem:[#allocation2 + $0x68] sm:$0xff] %v1259_v0 }
  0x8c   : > { %277 = vst [vmem:[#allocation2 + $0x8] sm:$0xff] %v1259_v0  ;;  %278 = vst [vmem:[#allocation2 + $0x48] sm:$0xff] %v1259_v0 }
  0x8d   : > { %279 = vst [vmem:[#allocation2 + $0x40] sm:$0xff] %v1259_v0  ;;  %280 = vst [vmem:[#allocation2 + $0x20] sm:$0xff] %v1259_v0 }
  0x8e   : > { %281 = vst [vmem:[#allocation2 + $0x10] sm:$0xff] %v1259_v0  ;;  %282 = vst [vmem:[#allocation2 + $0x38] sm:$0xff] %v1259_v0 }
  0x8f   : > { %283 = vst [vmem:[#allocation2 + $0x60] sm:$0xff] %v1259_v0  ;;  %284 = vst [vmem:[#allocation2 + $0x70] sm:$0xff] %v1259_v0 }
  0x90   : > { %285 = vst [vmem:[#allocation2 + $0x78] sm:$0xff] %v1259_v0  ;;  %286 = vst [vmem:[#allocation2 + $0x28] sm:$0xff] %v1259_v0 }
  0x91 PF: > { %s1793_s21 = sld [smem:[#allocation17_spill]] }
  0x97   : > { %p749_p1 = scmp.ge.s32.totalorder %s1793_s21, 2 }
  0x99   : > { %290 = sbr.rel (%p749_p1) target bundleno = 420 (0x1a4), region = 44 }
  0x9e   : > { %v370_v1 = vld [vmem:[%s1534_s23 + $0xf8] sm:$0xff]  ;;  %v369_v3 = vld [vmem:[%s1534_s23 + $0xf0] sm:$0xff]  ;;  %v368_v5 = vld [vmem:[%s1534_s23 + $0xe8] sm:$0xff] }
  0x9f   : > { %v354_v2 = vld [vmem:[%s1534_s23 + $0x78] sm:$0xff]  ;;  %761 = vmatprep.subr.mxu0 %v370_v1  ;;  %841 = vmatprep.subr.mxu1 %v370_v1  ;;  %v353_v4 = vld [vmem:[%s1534_s23 + $0x70] sm:$0xff]  ;;  %v352_v6 = vld [vmem:[%s1534_s23 + $0x68] sm:$0xff] }
  0xa0   : > { %762 = vmatpush3.msra.mxu0 %v354_v2  ;;  %857 = vmatpush3.msra.mxu1 %v354_v2  ;;  %v367_v7 = vld [vmem:[%s1534_s23 + $0xe0] sm:$0xff]  ;;  %v366_v9 = vld [vmem:[%s1534_s23 + $0xd8] sm:$0xff]  ;;  %v365_v11 = vld [vmem:[%s1534_s23 + $0xd0] sm:$0xff] }
  0xa1   : > { %763 = vmatprep.subr.mxu0 %v369_v3  ;;  %842 = vmatprep.subr.mxu1 %v369_v3  ;;  %v351_v8 = vld [vmem:[%s1534_s23 + $0x60] sm:$0xff]  ;;  %v350_v10 = vld [vmem:[%s1534_s23 + $0x58] sm:$0xff]  ;;  %v349_v12 = vld [vmem:[%s1534_s23 + $0x50] sm:$0xff] }
  0xa2   : > { %764 = vmatpush3.msra.mxu0 %v353_v4  ;;  %858 = vmatpush3.msra.mxu1 %v353_v4  ;;  %v364_v13 = vld [vmem:[%s1534_s23 + $0xc8] sm:$0xff]  ;;  %v363_v15 = vld [vmem:[%s1534_s23 + $0xc0] sm:$0xff]  ;;  %v362_v17 = vld [vmem:[%s1534_s23 + $0xb8] sm:$0xff] }
  0xa3   : > { %765 = vmatprep.subr.mxu0 %v368_v5  ;;  %843 = vmatprep.subr.mxu1 %v368_v5  ;;  %v348_v14 = vld [vmem:[%s1534_s23 + $0x48] sm:$0xff]  ;;  %v347_v16 = vld [vmem:[%s1534_s23 + $0x40] sm:$0xff]  ;;  %v346_v18 = vld [vmem:[%s1534_s23 + $0x38] sm:$0xff] }
  0xa4   : > { %766 = vmatpush3.msra.mxu0 %v352_v6  ;;  %859 = vmatpush3.msra.mxu1 %v352_v6  ;;  %v361_v19 = vld [vmem:[%s1534_s23 + $0xb0] sm:$0xff]  ;;  %v360_v21 = vld [vmem:[%s1534_s23 + $0xa8] sm:$0xff]  ;;  %v359_v23 = vld [vmem:[%s1534_s23 + $0xa0] sm:$0xff] }
  0xa5   : > { %767 = vmatprep.subr.mxu0 %v367_v7  ;;  %844 = vmatprep.subr.mxu1 %v367_v7  ;;  %v345_v20 = vld [vmem:[%s1534_s23 + $0x30] sm:$0xff]  ;;  %v344_v22 = vld [vmem:[%s1534_s23 + $0x28] sm:$0xff]  ;;  %v343_v24 = vld [vmem:[%s1534_s23 + $0x20] sm:$0xff] }
  0xa6   : > { %768 = vmatpush3.msra.mxu0 %v351_v8  ;;  %860 = vmatpush3.msra.mxu1 %v351_v8  ;;  %v358_v25 = vld [vmem:[%s1534_s23 + $0x98] sm:$0xff]  ;;  %v357_v27 = vld [vmem:[%s1534_s23 + $0x90] sm:$0xff]  ;;  %v356_v29 = vld [vmem:[%s1534_s23 + $0x88] sm:$0xff] }
  0xa7   : > { %769 = vmatprep.subr.mxu0 %v366_v9  ;;  %845 = vmatprep.subr.mxu1 %v366_v9  ;;  %v342_v26 = vld [vmem:[%s1534_s23 + $0x18] sm:$0xff]  ;;  %v341_v28 = vld [vmem:[%s1534_s23 + $0x10] sm:$0xff]  ;;  %v340_v30 = vld [vmem:[%s1534_s23 + $0x8] sm:$0xff] }
  0xa8   : > { %770 = vmatpush3.msra.mxu0 %v350_v10  ;;  %861 = vmatpush3.msra.mxu1 %v350_v10  ;;  %v355_v31 = vld [vmem:[%s1534_s23 + $0x80] sm:$0xff]  ;;  %v308_v33 = vld [vmem:[%s1527_s4 + $0x8] sm:$0xff]  ;;  %v310_v37 = vld [vmem:[%s1527_s4 + $0x18] sm:$0xff] }
  0xa9   : > { %771 = vmatprep.subr.mxu0 %v365_v11  ;;  %846 = vmatprep.subr.mxu1 %v365_v11  ;;  %v339_v32 = vld [vmem:[%s1534_s23] sm:$0xff]  ;;  %v324_v34 = vld [vmem:[%s1527_s4 + $0x88] sm:$0xff]  ;;  %v326_v38 = vld [vmem:[%s1527_s4 + $0x98] sm:$0xff] }
  0xaa   : > { %772 = vmatpush3.msra.mxu0 %v349_v12  ;;  %862 = vmatpush3.msra.mxu1 %v349_v12  ;;  %v307_v35 = vld [vmem:[%s1527_s4] sm:$0xff]  ;;  %v309_v39 = vld [vmem:[%s1527_s4 + $0x10] sm:$0xff]  ;;  %v312_v41 = vld [vmem:[%s1527_s4 + $0x28] sm:$0xff] }
  0xab   : > { %773 = vmatprep.subr.mxu0 %v364_v13  ;;  %847 = vmatprep.subr.mxu1 %v364_v13  ;;  %v323_v36 = vld [vmem:[%s1527_s4 + $0x80] sm:$0xff]  ;;  %v325_v40 = vld [vmem:[%s1527_s4 + $0x90] sm:$0xff]  ;;  %v328_v42 = vld [vmem:[%s1527_s4 + $0xa8] sm:$0xff] }
  0xac   : > { %774 = vmatpush3.msra.mxu0 %v348_v14  ;;  %863 = vmatpush3.msra.mxu1 %v348_v14  ;;  %v311_v43 = vld [vmem:[%s1527_s4 + $0x20] sm:$0xff]  ;;  %v314_v45 = vld [vmem:[%s1527_s4 + $0x38] sm:$0xff]  ;;  %v313_v47 = vld [vmem:[%s1527_s4 + $0x30] sm:$0xff] }
  0xad   : > { %775 = vmatprep.subr.mxu0 %v363_v15  ;;  %848 = vmatprep.subr.mxu1 %v363_v15  ;;  %v327_v44 = vld [vmem:[%s1527_s4 + $0xa0] sm:$0xff]  ;;  %v330_v46 = vld [vmem:[%s1527_s4 + $0xb8] sm:$0xff]  ;;  %v329_v48 = vld [vmem:[%s1527_s4 + $0xb0] sm:$0xff] }
  0xae   : > { %776 = vmatpush3.msra.mxu0 %v347_v16  ;;  %864 = vmatpush3.msra.mxu1 %v347_v16  ;;  %v316_v49 = vld [vmem:[%s1527_s4 + $0x48] sm:$0xff]  ;;  %v315_v51 = vld [vmem:[%s1527_s4 + $0x40] sm:$0xff]  ;;  %v318_v53 = vld [vmem:[%s1527_s4 + $0x58] sm:$0xff] }
  0xaf   : > { %777 = vmatprep.subr.mxu0 %v362_v17  ;;  %849 = vmatprep.subr.mxu1 %v362_v17  ;;  %v332_v50 = vld [vmem:[%s1527_s4 + $0xc8] sm:$0xff]  ;;  %v331_v52 = vld [vmem:[%s1527_s4 + $0xc0] sm:$0xff]  ;;  %v334_v54 = vld [vmem:[%s1527_s4 + $0xd8] sm:$0xff] }
  0xb0   : > { %778 = vmatpush3.msra.mxu0 %v346_v18  ;;  %865 = vmatpush3.msra.mxu1 %v346_v18  ;;  %v317_v55 = vld [vmem:[%s1527_s4 + $0x50] sm:$0xff]  ;;  %v320_v57 = vld [vmem:[%s1527_s4 + $0x68] sm:$0xff]  ;;  %v319_v59 = vld [vmem:[%s1527_s4 + $0x60] sm:$0xff] }
  0xb1   : > { %779 = vmatprep.subr.mxu0 %v361_v19  ;;  %850 = vmatprep.subr.mxu1 %v361_v19  ;;  %v333_v56 = vld [vmem:[%s1527_s4 + $0xd0] sm:$0xff]  ;;  %v336_v58 = vld [vmem:[%s1527_s4 + $0xe8] sm:$0xff]  ;;  %v335_v60 = vld [vmem:[%s1527_s4 + $0xe0] sm:$0xff] }
  0xb2   : > { %780 = vmatpush3.msra.mxu0 %v345_v20  ;;  %866 = vmatpush3.msra.mxu1 %v345_v20  ;;  %v322_v61 = vld [vmem:[%s1527_s4 + $0x78] sm:$0xff]  ;;  %v321_v63 = vld [vmem:[%s1527_s4 + $0x70] sm:$0xff]  ;;  %v299_v5 = vld [vmem:[#allocation2 + $0x40] sm:$0xff] }
  0xb3   : > { %781 = vmatprep.subr.mxu0 %v360_v21  ;;  %851 = vmatprep.subr.mxu1 %v360_v21  ;;  %v338_v62 = vld [vmem:[%s1527_s4 + $0xf8] sm:$0xff]  ;;  %v337_v0 = vld [vmem:[%s1527_s4 + $0xf0] sm:$0xff]  ;;  %v292_v13 = vld [vmem:[#allocation2] sm:$0xff] }
  0xb4   : > { %782 = vmatpush3.msra.mxu0 %v344_v22  ;;  %867 = vmatpush3.msra.mxu1 %v344_v22  ;;  %v291_v3 = vld [vmem:[#allocation2 + $0x30] sm:$0xff]  ;;  %v300_v15 = vld [vmem:[#allocation2 + $0x20] sm:$0xff] }
  0xb5   : > { %783 = vmatprep.subr.mxu0 %v359_v23  ;;  %852 = vmatprep.subr.mxu1 %v359_v23  ;;  %v293_v23 = vld [vmem:[#allocation2 + $0x58] sm:$0xff] }
  0xb6   : > { %784 = vmatpush3.msra.mxu0 %v343_v24  ;;  %868 = vmatpush3.msra.mxu1 %v343_v24 }
  0xb7   : > { %785 = vmatprep.subr.mxu0 %v358_v25  ;;  %853 = vmatprep.subr.mxu1 %v358_v25  ;;  %v301_v25 = vld [vmem:[#allocation2 + $0x10] sm:$0xff] }
  0xb8   : > { %786 = vmatpush3.msra.mxu0 %v342_v26  ;;  %869 = vmatpush3.msra.mxu1 %v342_v26 }
  0xb9   : > { %787 = vmatprep.subr.mxu0 %v357_v27  ;;  %854 = vmatprep.subr.mxu1 %v357_v27 }
  0xba   : > { %788 = vmatpush3.msra.mxu0 %v341_v28  ;;  %870 = vmatpush3.msra.mxu1 %v341_v28 }
  0xbb   : > { %789 = vmatprep.subr.mxu0 %v356_v29  ;;  %855 = vmatprep.subr.mxu1 %v356_v29 }
  0xbc   : > { %790 = vmatpush3.msra.mxu0 %v340_v30  ;;  %871 = vmatpush3.msra.mxu1 %v340_v30 }
  0xbd   : > { %791 = vmatprep.subr.mxu0 %v355_v31  ;;  %856 = vmatprep.subr.mxu1 %v355_v31 }
  0xbe   : > { %792 = vmatpush3.msra.mxu0 %v339_v32  ;;  %872 = vmatpush3.msra.mxu1 %v339_v32 }
  0xbf   : > { %435 = vmatprep.mubr.f32.mxu0 %v308_v33  ;;  %475 = vmatprep.mubr.f32.mxu1 %v324_v34  ;;  %v294_v33 = vld [vmem:[#allocation2 + $0x18] sm:$0xff] }
  0xc0   : > { %436 = vmatmul.mubr.f32.vlgmr.msra.gmra.mxu0 %v307_v35  ;;  %476 = vmatmul.mubr.f32.vlgmr.msra.gmra.mxu1 %v323_v36  ;;  %v302_v35 = vld [vmem:[#allocation2 + $0x38] sm:$0xff] }
  0xc1   : > { %440 = vmatprep.mubr.f32.mxu0 %v310_v37  ;;  %480 = vmatprep.mubr.f32.mxu1 %v326_v38 }
  0xc4   : > { %441 = vmatmul.mubr.f32.gmra.mxu0 %v309_v39  ;;  %481 = vmatmul.mubr.f32.gmra.mxu1 %v325_v40 }
  0xc5   : > { %445 = vmatprep.mubr.f32.mxu0 %v312_v41  ;;  %485 = vmatprep.mubr.f32.mxu1 %v328_v42 }
  0xc8   : > { %446 = vmatmul.mubr.f32.gmra.mxu0 %v311_v43  ;;  %486 = vmatmul.mubr.f32.gmra.mxu1 %v327_v44  ;;  %v295_v43 = vld [vmem:[#allocation2 + $0x50] sm:$0xff] }
  0xc9   : > { %450 = vmatprep.mubr.f32.mxu0 %v314_v45  ;;  %490 = vmatprep.mubr.f32.mxu1 %v330_v46  ;;  %v303_v45 = vld [vmem:[#allocation2 + $0x60] sm:$0xff] }
  0xcc   : > { %451 = vmatmul.mubr.f32.gmra.mxu0 %v313_v47  ;;  %491 = vmatmul.mubr.f32.gmra.mxu1 %v329_v48 }
  0xcd   : > { %455 = vmatprep.mubr.f32.mxu0 %v316_v49  ;;  %495 = vmatprep.mubr.f32.mxu1 %v332_v50 }
  0xd0   : > { %456 = vmatmul.mubr.f32.gmra.mxu0 %v315_v51  ;;  %496 = vmatmul.mubr.f32.gmra.mxu1 %v331_v52 }
  0xd1   : > { %460 = vmatprep.mubr.f32.mxu0 %v318_v53  ;;  %500 = vmatprep.mubr.f32.mxu1 %v334_v54  ;;  %v296_v53 = vld [vmem:[#allocation2 + $0x68] sm:$0xff] }
  0xd4   : > { %461 = vmatmul.mubr.f32.gmra.mxu0 %v317_v55  ;;  %501 = vmatmul.mubr.f32.gmra.mxu1 %v333_v56  ;;  %v304_v55 = vld [vmem:[#allocation2 + $0x70] sm:$0xff] }
  0xd5   : > { %465 = vmatprep.mubr.f32.mxu0 %v320_v57  ;;  %505 = vmatprep.mubr.f32.mxu1 %v336_v58 }
  0xd8   : > { %466 = vmatmul.mubr.f32.gmra.mxu0 %v319_v59  ;;  %506 = vmatmul.mubr.f32.gmra.mxu1 %v335_v60 }
  0xd9   : > { %470 = vmatprep.mubr.f32.mxu0 %v322_v61  ;;  %510 = vmatprep.mubr.f32.mxu1 %v338_v62 }
  0xdc   : > { %471 = vmatmul.mubr.f32.gmra.mxu0 %v321_v63  ;;  %511 = vmatmul.mubr.f32.gmra.mxu1 %v337_v0  ;;  %v297_v63 = vld [vmem:[#allocation2 + $0x8] sm:$0xff] }
 0x180   : > { %v793_v1 = vpop.f32.mrf.mxu0  ;;  %v817_v2 = vpop.f32.mrf.mxu1 }
 0x182   : > { %v794_v4 = vpop.f32.mrf.mxu0  ;;  %v818_v6 = vpop.f32.mrf.mxu1 }
 0x183   : > { %v795_v7 = vadd.f32 %v794_v4, %v793_v1  ;;  %v819_v8 = vadd.f32 %v818_v6, %v817_v2  ;;  %v305_v1 = vld [vmem:[#allocation2 + $0x78] sm:$0xff] }
 0x184   : > { %v796_v9 = vpop.f32.mrf.mxu0  ;;  %v820_v10 = vpop.f32.mrf.mxu1 }
 0x185   : > { %v516_v11 = vadd.f32 %v795_v7, %v291_v3  ;;  %v524_v12 = vadd.f32 %v819_v8, %v299_v5 }
 0x186   : > { %v797_v14 = vpop.f32.mrf.mxu0  ;;  %v821_v16 = vpop.f32.mrf.mxu1 }
 0x187   : > { %532 = vst [vmem:[#allocation2 + $0x30] sm:$0xff] %v516_v11  ;;  %540 = vst [vmem:[#allocation2 + $0x40] sm:$0xff] %v524_v12  ;;  %v798_v17 = vadd.f32 %v797_v14, %v796_v9  ;;  %v822_v18 = vadd.f32 %v821_v16, %v820_v10  ;;  %v298_v9 = vld [vmem:[#allocation2 + $0x48] sm:$0xff] }
 0x188   : > { %v799_v19 = vpop.f32.mrf.mxu0  ;;  %v823_v20 = vpop.f32.mrf.mxu1  ;;  %v306_v11 = vld [vmem:[#allocation2 + $0x28] sm:$0xff] }
 0x189   : > { %v517_v21 = vadd.f32 %v798_v17, %v292_v13  ;;  %v525_v22 = vadd.f32 %v822_v18, %v300_v15 }
 0x18a   : > { %v800_v24 = vpop.f32.mrf.mxu0  ;;  %v824_v26 = vpop.f32.mrf.mxu1 }
 0x18b   : > { %533 = vst [vmem:[#allocation2] sm:$0xff] %v517_v21  ;;  %541 = vst [vmem:[#allocation2 + $0x20] sm:$0xff] %v525_v22  ;;  %v801_v27 = vadd.f32 %v800_v24, %v799_v19  ;;  %v825_v28 = vadd.f32 %v824_v26, %v823_v20 }
 0x18c   : > { %v802_v29 = vpop.f32.mrf.mxu0  ;;  %v826_v30 = vpop.f32.mrf.mxu1 }
 0x18d   : > { %v518_v31 = vadd.f32 %v801_v27, %v293_v23  ;;  %v526_v32 = vadd.f32 %v825_v28, %v301_v25 }
 0x18e   : > { %v803_v34 = vpop.f32.mrf.mxu0  ;;  %v827_v36 = vpop.f32.mrf.mxu1 }
 0x18f   : > { %534 = vst [vmem:[#allocation2 + $0x58] sm:$0xff] %v518_v31  ;;  %542 = vst [vmem:[#allocation2 + $0x10] sm:$0xff] %v526_v32  ;;  %v804_v37 = vadd.f32 %v803_v34, %v802_v29  ;;  %v828_v38 = vadd.f32 %v827_v36, %v826_v30 }
 0x190   : > { %v805_v39 = vpop.f32.mrf.mxu0  ;;  %v829_v40 = vpop.f32.mrf.mxu1 }
 0x191   : > { %v519_v41 = vadd.f32 %v804_v37, %v294_v33  ;;  %v527_v42 = vadd.f32 %v828_v38, %v302_v35 }
 0x192   : > { %v806_v44 = vpop.f32.mrf.mxu0  ;;  %v830_v46 = vpop.f32.mrf.mxu1 }
 0x193   : > { %535 = vst [vmem:[#allocation2 + $0x18] sm:$0xff] %v519_v41  ;;  %543 = vst [vmem:[#allocation2 + $0x38] sm:$0xff] %v527_v42  ;;  %v807_v47 = vadd.f32 %v806_v44, %v805_v39  ;;  %v831_v48 = vadd.f32 %v830_v46, %v829_v40 }
 0x194   : > { %v808_v49 = vpop.f32.mrf.mxu0  ;;  %v832_v50 = vpop.f32.mrf.mxu1 }
 0x195   : > { %v520_v51 = vadd.f32 %v807_v47, %v295_v43  ;;  %v528_v52 = vadd.f32 %v831_v48, %v303_v45 }
 0x196   : > { %v809_v54 = vpop.f32.mrf.mxu0  ;;  %v833_v56 = vpop.f32.mrf.mxu1 }
 0x197   : > { %536 = vst [vmem:[#allocation2 + $0x50] sm:$0xff] %v520_v51  ;;  %544 = vst [vmem:[#allocation2 + $0x60] sm:$0xff] %v528_v52  ;;  %v810_v57 = vadd.f32 %v809_v54, %v808_v49  ;;  %v834_v58 = vadd.f32 %v833_v56, %v832_v50 }
 0x198   : > { %v811_v59 = vpop.f32.mrf.mxu0  ;;  %v835_v60 = vpop.f32.mrf.mxu1 }
 0x199   : > { %v521_v61 = vadd.f32 %v810_v57, %v296_v53  ;;  %v529_v62 = vadd.f32 %v834_v58, %v304_v55 }
 0x19a   : > { %v812_v0 = vpop.f32.mrf.mxu0  ;;  %v836_v2 = vpop.f32.mrf.mxu1 }
 0x19b   : > { %537 = vst [vmem:[#allocation2 + $0x68] sm:$0xff] %v521_v61  ;;  %545 = vst [vmem:[#allocation2 + $0x70] sm:$0xff] %v529_v62  ;;  %v813_v3 = vadd.f32 %v812_v0, %v811_v59  ;;  %v837_v4 = vadd.f32 %v836_v2, %v835_v60 }
 0x19c   : > { %v814_v5 = vpop.f32.mrf.mxu0  ;;  %v838_v6 = vpop.f32.mrf.mxu1 }
 0x19d   : > { %v522_v7 = vadd.f32 %v813_v3, %v297_v63  ;;  %v530_v8 = vadd.f32 %v837_v4, %v305_v1 }
 0x19e   : > { %v815_v10 = vpop.f32.mrf.mxu0  ;;  %v839_v12 = vpop.f32.mrf.mxu1 }
 0x19f   : > { %538 = vst [vmem:[#allocation2 + $0x8] sm:$0xff] %v522_v7  ;;  %546 = vst [vmem:[#allocation2 + $0x78] sm:$0xff] %v530_v8  ;;  %v816_v13 = vadd.f32 %v815_v10, %v814_v5  ;;  %v840_v14 = vadd.f32 %v839_v12, %v838_v6 }
 0x1a1   : > { %v523_v15 = vadd.f32 %v816_v13, %v298_v9  ;;  %v531_v16 = vadd.f32 %v840_v14, %v306_v11 }
 0x1a3   : > { %539 = vst [vmem:[#allocation2 + $0x48] sm:$0xff] %v523_v15  ;;  %547 = vst [vmem:[#allocation2 + $0x28] sm:$0xff] %v531_v16 }
 0x1a4 PF: > { %s1794_s27 = sld [smem:[#allocation17_spill]] }
 0x1aa   : > { %p750_p10 = scmp.lt.s32.totalorder %s1794_s27, 1 }
 0x1ac   : > { %551 = sbr.rel (%p750_p10) target bundleno = 442 (0x1ba), region = 48 }
 0x1b1   : > { %v552_v17 = vld [vmem:[#allocation2 + $0x30] sm:$0xff]  ;;  %v553_v18 = vld [vmem:[#allocation2] sm:$0xff]  ;;  %v554_v19 = vld [vmem:[#allocation2 + $0x58] sm:$0xff] }
 0x1b2   : > { %568 = vst [vmem:[%s1543_s10] sm:$0xff] %v552_v17  ;;  %569 = vst [vmem:[%s1543_s10 + $0x8] sm:$0xff] %v553_v18  ;;  %v555_v20 = vld [vmem:[#allocation2 + $0x18] sm:$0xff]  ;;  %v556_v21 = vld [vmem:[#allocation2 + $0x50] sm:$0xff] }
 0x1b3   : > { %570 = vst [vmem:[%s1543_s10 + $0x10] sm:$0xff] %v554_v19  ;;  %v557_v22 = vld [vmem:[#allocation2 + $0x68] sm:$0xff]  ;;  %571 = vst [vmem:[%s1543_s10 + $0x18] sm:$0xff] %v555_v20  ;;  %v560_v25 = vld [vmem:[#allocation2 + $0x40] sm:$0xff] }
 0x1b4   : > { %572 = vst [vmem:[%s1543_s10 + $0x20] sm:$0xff] %v556_v21  ;;  %573 = vst [vmem:[%s1543_s10 + $0x28] sm:$0xff] %v557_v22  ;;  %v558_v23 = vld [vmem:[#allocation2 + $0x8] sm:$0xff]  ;;  %v561_v26 = vld [vmem:[#allocation2 + $0x20] sm:$0xff] }
 0x1b5   : > { %v559_v24 = vld [vmem:[#allocation2 + $0x48] sm:$0xff]  ;;  %574 = vst [vmem:[%s1543_s10 + $0x30] sm:$0xff] %v558_v23  ;;  %576 = vst [vmem:[%s1543_s10 + $0x40] sm:$0xff] %v560_v25  ;;  %v562_v27 = vld [vmem:[#allocation2 + $0x10] sm:$0xff] }
 0x1b6   : > { %575 = vst [vmem:[%s1543_s10 + $0x38] sm:$0xff] %v559_v24  ;;  %v563_v28 = vld [vmem:[#allocation2 + $0x38] sm:$0xff]  ;;  %577 = vst [vmem:[%s1543_s10 + $0x48] sm:$0xff] %v561_v26  ;;  %v564_v29 = vld [vmem:[#allocation2 + $0x60] sm:$0xff] }
 0x1b7   : > { %578 = vst [vmem:[%s1543_s10 + $0x50] sm:$0xff] %v562_v27  ;;  %579 = vst [vmem:[%s1543_s10 + $0x58] sm:$0xff] %v563_v28  ;;  %v565_v30 = vld [vmem:[#allocation2 + $0x70] sm:$0xff]  ;;  %v566_v31 = vld [vmem:[#allocation2 + $0x78] sm:$0xff] }
 0x1b8   : > { %580 = vst [vmem:[%s1543_s10 + $0x60] sm:$0xff] %v564_v29  ;;  %581 = vst [vmem:[%s1543_s10 + $0x68] sm:$0xff] %v565_v30  ;;  %v567_v32 = vld [vmem:[#allocation2 + $0x28] sm:$0xff] }
 0x1b9   : > { %582 = vst [vmem:[%s1543_s10 + $0x70] sm:$0xff] %v566_v31  ;;  %583 = vst [vmem:[%s1543_s10 + $0x78] sm:$0xff] %v567_v32 }
 0x1ba PF: > { %s1795_s13 = sld [smem:[#allocation17_spill]]  ;;  %s605_s19 = sshll.u32 %s1543_s10, 4  ;;  %s1631_s19 = int_to_ptr.vmem [resolvable:$true] %s605_s19 }
 0x1bb   : > { %s1796_s7 = sld [smem:[#allocation19_spill]]  ;;  %s1641_s20 = scalar_lea.sflag [#allocation5], %s251_s0 }
 0x1bc   : > { %s1797_s29 = sld [smem:[#allocation18_spill]]  ;;  %s1086_s5 = scalar_lea.vmem %s1631_s19, 2048 }
 0x1bd   : > { %s1799_s2 = sld [smem:[#allocation24_spill]]  ;;  %p1087_p4 = scmp.ne.s32.totalorder %s1631_s19, %s1086_s5 }
 0x1be   : > { %s1800_s14 = sld [smem:[#allocation30_spill]]  ;;  %s1260_s10 = smov [#allocation8]  }
 0x1bf   : > { %s1090_s21 = sshll.u32 %s1260_s10, 4  ;;  %s1091_s21 = int_to_ptr.vmem [resolvable:$false] %s1090_s21 }
 0x1c0   : > { %s752_s16 = sadd.s32 4294967295, %s1795_s13  ;;  %s1092_s27 = scalar_lea.vmem %s1091_s21, 4096 }
 0x1c1   : > { %p593_p9 = scmp.gt.s32.totalorder %s752_s16, 0  ;;  %s873_s18 = smul.u32 192, %s1796_s7 }
 0x1c2   : > { %p1093_p5 = scmp.lt.s32.totalorder %s1631_s19, %s1091_s21  ;;  %p1094_p0 = scmp.lt.s32.totalorder %s1092_s27, %s1086_s5 }
 0x1c3   : > { %s1845_s16 = smov (!%p593_p9, %s752_s16), 0  ;;  %p1802_p2 = scmp.ne.s32.totalorder %s1799_s2, 0 }
 0x1c4   : > { %s753_s28 = sshll.u32 %s1845_s16, 1  ;;  %s1801_s6 = smov %s1800_s14 }
 0x1c5   : > { %s596_s4 = sadd.s32 %s1797_s29, %s753_s28  ;;  %p1088_p3 = pnand %p1087_p4, %p1802_p2 }
 0x1c6   : > { %s602_s25 = sadd.s32 %s873_s18, %s596_s4  ;;  %p1095_p6 = por %p1094_p0, %p1093_p5 }
 0x1c7   : > { %s756_s8 = sshll.u32 %s602_s25, 7  ;;  %p1089_p11 = pneg %p1088_p3 }
 0x1c8   : > { %s1637_s23 = scalar_lea.hbm %s1800_s14, %s756_s8 }
 0x1c9   : > { %p1096_p12 = pnand %p1095_p6, %p1089_p11 }
 0x1cb   : > { %1099 = shalt.err (!%p1096_p12)
}
 0x1cc   : > { %s1100_s0 = scalar_lea.hbm %s1637_s23, 2048  ;;  %s1104_s29 = scalar_lea.hbm %s1801_s6, 49152 }
 0x1cd   : > { %p1101_p13 = scmp.ne.s32.totalorder %s1637_s23, %s1100_s0  ;;  %p1105_p1 = scmp.lt.s32.totalorder %s1637_s23, %s1801_s6 }
 0x1ce   : > { %p1106_p10 = scmp.lt.s32.totalorder %s1104_s29, %s1100_s0 }
 0x1cf   : > { %p1102_p7 = pnand %p1101_p13, %p1802_p2 }
 0x1d0   : > { %p1107_p9 = por %p1106_p10, %p1105_p1 }
 0x1d1   : > { %p1103_p8 = pneg %p1102_p7 }
 0x1d3   : > { %p1108_p4 = pnand %p1107_p9, %p1103_p8 }
 0x1d5   : > { %1111 = shalt.err (!%p1108_p4)
}
 0x1d6   : > { %s1261_s18 = smov 128   ;;  %s1262_s28 = smov 1536  }
 0x1d7   : > { %s1263_s4 = smov 8  }
 0x1d8   : > { %878 = dma.vmem_to_hbm [thread:$0]  (%p1802_p2), %s1631_s19, 2048, %s1637_s23, %s1641_s20, %s1261_s18, %s1262_s28, %s1263_s4  }
 0x1d9 PF: > { %s1803_s25 = sld [smem:[#allocation12_spill]]  ;;  %p892_p3 = scmp.ge.s32.totalorder %s1250_s24, 2 }
 0x1da   : > { %s1804_s8 = sld [smem:[#allocation25_spill]] }
 0x1df   : > { %s620_s9 = sand.u32 1, %s1803_s25  }
 0x1e0   : > { %p1805_p11 = scmp.ne.s32.totalorder %s1804_s8, 0  ;;  %s621_s30 = scalar_lea.sflag [#allocation5], %s620_s9 }
 0x1e2   : > { %p888_p5 = pnand %p892_p3, %p1805_p11 }
 0x1e4   : > { %p889_p0 = pneg %p888_p5 }
 0x1e6   : > { %1185 = dma.done.wait (%p889_p0), %s621_s30, 2048  }
 0x1e7   : > { %1187 = vsyncadd (%p889_p0), %s621_s30, 4294965248  ;;  %s21_s24 = sadd.s32 1, %s1250_s24   ;;  %s1807_s9 = sld [smem:[#allocation13_spill]] }
 0x1e8   : > { %p1669_p6 = scmp.ge.s32.totalorder %s21_s24, 30   ;;  %s1808_s2 = sld [smem:[#allocation14_spill]] }
 0x1e9   : > { %s1809_s13 = sld [smem:[#allocation15_spill]]  ;;  %s1812_s20 = smov %s1497_s12 }
 0x1ea   : > { %s1810_s19 = sld [smem:[#allocation28_spill]]  ;;  %s1816_s27 = smov %s1835_s15 }
 0x1eb   : > { %s1811_s23 = sld [smem:[#allocation16_spill]]  ;;  %s1819_s10 = smov %s1198_s11 }
 0x1ec   : > { %s1813_s18 = sld [smem:[#allocation20_spill]]  ;;  %s1820_s11 = smov %s1517_s3 }
 0x1ed   : > { %s1814_s5 = sld [smem:[#allocation21_spill]]  ;;  %s1824_s16 = smov %s1222_s17 }
 0x1ee   : > { %s1815_s21 = sld [smem:[#allocation22_spill]]  ;;  %s1821_s12 = smov %s1808_s2 }
 0x1ef   : > { %s1817_s0 = sld [smem:[#allocation27_spill]]  ;;  %s1825_s17 = smov %s1812_s20 }
 0x1f0   : > { %s1822_s14 = smov %s1810_s19  ;;  %s1826_s19 = smov %s1242_s22 }
 0x1f1   : > { %s1823_s15 = smov %s1811_s23  ;;  %s1828_s22 = smov %s1816_s27 }
 0x1f2   :  { %20 = sbr.rel (!%p1669_p6) target bundleno = 16 (0x10), region = 98 }
 0x1f3   : > { %s1827_s20 = smov %s1814_s5 }
 0x1f5   : > { %s1829_s23 = smov %s1817_s0 }
 0x1f7   :  { %626 = vsyncpa [#allocation4], 1 }
 0x1f8   :  { %628 = vsyncpa [#allocation4 + $0x1], 1 }
 0x1f9   :  { %629 = vsyncpa [#allocation7], 1 }
 0x1fa   :  { %631 = vsyncpa [#allocation7 + $0x1], 1 }
 0x1fb   :  { %632 = vsyncpa [#allocation5], 1 }
 0x1fc   :  { %634 = vsyncpa [#allocation5 + $0x1], 1 }

</bundles_post_ra>
